<compile_context>
chip_gen: v7x
topology: tpu7x:2x2x1
jax: 0.10.0
libtpu: 0.0.40
codegen_flags: <defaults>
</compile_context>

<pallas_src>
import functools
import math

import jax
import jax.numpy as jnp
from jax.experimental import pallas as pl
from jax.experimental.pallas import tpu as pltpu

_HALF_LOG_2PI = 0.5 * math.log(2.0 * math.pi)
_VMEM_LIMIT_BYTES = 32 * 1024 * 1024     # <= scoped defaults on v6e/v7x, well under v5e physical
_STREAM_BUDGET_BYTES = 16 * 1024 * 1024  # double-buffered input streams per tile


def _gaussian_logprob(mean_ref, std_ref, act_ref):
    """Elementwise Normal(mean, std).log_prob(act) in float32."""
    mean = mean_ref[...].astype(jnp.float32)
    std = std_ref[...].astype(jnp.float32)
    act = act_ref[...].astype(jnp.float32)
    inv_std = pl.reciprocal(std, approx=False)   # single EUP issue; exact (1e-5 tolerance)
    z = (act - mean) * inv_std
    return -0.5 * (z * z) - jnp.log(std) - _HALF_LOG_2PI


# ----------------------------- lane-packed kernel -----------------------------
def _a2c_kernel_packed(mean_ref, std_ref, act_ref, adv_ref, out_ref, acc_ref, *,
                       batch_size: int, action_dim: int, groups_per_row: int,
                       block_rows: int, needs_mask: bool):
    j = pl.program_id(0)
    n_j = pl.num_programs(0)

    @pl.when(j == 0)
    def _init():
        acc_ref[...] = jnp.zeros_like(acc_ref)

    logprob = _gaussian_logprob(mean_ref, std_ref, act_ref)     # (tb, 128) f32
    adv = adv_ref[...].astype(jnp.float32)                      # (tb, G)
    tb = logprob.shape[0]
    A = action_dim
    G = groups_per_row
    offset = jnp.float32(A * 1e-05)                             # sum_a 1e-5 per batch row

    if needs_mask:
        row0 = j * block_rows
        row_ids = row0 + jax.lax.broadcasted_iota(jnp.int32, (tb, 1), 0)

    # Each 128-lane packed row holds G = 128//A consecutive batch rows.
    # Reduce each A-wide lane group, then multiply ONCE by its advantage.
    tile_sum = jnp.zeros((tb, 1), jnp.float32)
    for g in range(G):
        grp = jnp.sum(logprob[:, g * A:(g + 1) * A], axis=-1, keepdims=True)   # (tb, 1)
        contrib = (grp + offset) * adv[:, g:g + 1]                              # (tb, 1)
        if needs_mask:
            gid = row_ids * G + g
            # Select (not multiply-by-mask): garbage rows past B may hold NaN/Inf.
            contrib = jnp.where(gid < batch_size, contrib, 0.0)
        tile_sum = tile_sum + contrib

    acc_ref[...] += jnp.sum(tile_sum, keepdims=True)            # (1, 1) f32

    @pl.when(j == n_j - 1)
    def _finalize():
        out_ref[...] = jnp.broadcast_to(acc_ref[...], out_ref.shape)


# ------------------------- row-wise fallback kernel ---------------------------
def _a2c_kernel_rowwise(mean_ref, std_ref, act_ref, adv_ref, out_ref, acc_ref, *,
                        batch_size: int, block_rows: int, needs_mask: bool):
    j = pl.program_id(0)
    n_j = pl.num_programs(0)

    @pl.when(j == 0)
    def _init():
        acc_ref[...] = jnp.zeros_like(acc_ref)

    logprob = _gaussian_logprob(mean_ref, std_ref, act_ref)     # (tb, A) f32
    adv = adv_ref[...].astype(jnp.float32)                      # (tb, 1)
    tb, a_dim = logprob.shape

    row_sum = jnp.sum(logprob, axis=-1, keepdims=True) + jnp.float32(a_dim * 1e-05)
    contrib = row_sum * adv                                     # one multiply per row

    if needs_mask:
        row_ids = j * block_rows + jax.lax.broadcasted_iota(jnp.int32, (tb, 1), 0)
        contrib = jnp.where(row_ids < batch_size, contrib, 0.0)

    acc_ref[...] += jnp.sum(contrib, keepdims=True)

    @pl.when(j == n_j - 1)
    def _finalize():
        out_ref[...] = jnp.broadcast_to(acc_ref[...], out_ref.shape)


# --------------------------------- wrapper ------------------------------------
def _round_block(rows: int, total_rows: int) -> int:
    rows = max(8, rows - rows % 8)
    if rows >= total_rows:
        return total_rows            # single full block: always a legal block shape
    return rows


def _choose_block_rows_packed(n_rows: int, itemsize: int) -> int:
    # 3 full-width (128-lane) streams + the small advantage stream (lane-padded
    # in VMEM), double-buffered, sized by the *actual* input itemsize.
    bytes_per_row = (3 * 128 + 128) * itemsize * 2
    return _round_block(_STREAM_BUDGET_BYTES // bytes_per_row, n_rows)


def _choose_block_rows_rowwise(B: int, A: int, itemsize: int) -> int:
    lane_width = max(128, -(-A // 128) * 128)
    bytes_per_row = (3 * lane_width + 128) * itemsize * 2
    return _round_block(_STREAM_BUDGET_BYTES // bytes_per_row, B)


def a2c_loss(mean: jax.Array, std: jax.Array, actions: jax.Array,
             advantages: jax.Array, *, block_rows=None):
    """A2C loss = mean((logprob(actions | mean, std) + 1e-5) * advantages)."""
    B, A = mean.shape
    assert std.shape == (B, A) and actions.shape == (B, A)
    assert advantages.shape == (B, 1)

    itemsize = jnp.dtype(mean.dtype).itemsize
    cost = pl.CostEstimate(
        flops=10 * B * A + 4 * B,
        transcendentals=2 * B * A,               # log + reciprocal per element
        bytes_accessed=3 * B * A * itemsize
        + B * jnp.dtype(advantages.dtype).itemsize
        + 8 * 128 * 4,
    )
    compiler_params = pltpu.CompilerParams(
        dimension_semantics=("arbitrary",),       # reduction axis with resident accumulator
        vmem_limit_bytes=_VMEM_LIMIT_BYTES,
    )
    # TODO(synk): on v7x (2 TensorCores/chip) add a leading CORE_PARALLEL grid
    # axis (or pl.core_map) to shard batch tiles across both cores; on
    # single-TC v5e/v6e a core axis is pure serialization overhead, so omitted.

    G = 128 // A if A <= 128 and 128 % A == 0 else 0
    packable = G >= 1 and G <= 32 and (B % G == 0)

    if packable:
        n_rows = (B * A) // 128
        args = (mean.reshape(n_rows, 128), std.reshape(n_rows, 128),
                actions.reshape(n_rows, 128), advantages.reshape(n_rows, G))
        tb = block_rows if block_rows is not None else _choose_block_rows_packed(n_rows, itemsize)
        tb = _round_block(min(tb, n_rows), n_rows)
        n_tiles = -(-n_rows // tb)
        kernel = functools.partial(
            _a2c_kernel_packed, batch_size=B, action_dim=A, groups_per_row=G,
            block_rows=tb, needs_mask=(n_rows % tb != 0))
        in_specs = [
            pl.BlockSpec((tb, 128), lambda j: (j, 0)),
            pl.BlockSpec((tb, 128), lambda j: (j, 0)),
            pl.BlockSpec((tb, 128), lambda j: (j, 0)),
            pl.BlockSpec((tb, G), lambda j: (j, 0)),
        ]
    else:
        args = (mean, std, actions, advantages)
        tb = block_rows if block_rows is not None else _choose_block_rows_rowwise(B, A, itemsize)
        tb = _round_block(min(tb, B), B)
        n_tiles = -(-B // tb)
        kernel = functools.partial(
            _a2c_kernel_rowwise, batch_size=B, block_rows=tb,
            needs_mask=(B % tb != 0))
        in_specs = [
            pl.BlockSpec((tb, A), lambda j: (j, 0)),
            pl.BlockSpec((tb, A), lambda j: (j, 0)),
            pl.BlockSpec((tb, A), lambda j: (j, 0)),
            pl.BlockSpec((tb, 1), lambda j: (j, 0)),
        ]

    partial_sum = pl.pallas_call(
        kernel,
        out_shape=jax.ShapeDtypeStruct((8, 128), jnp.float32),
        grid_spec=pltpu.PrefetchScalarGridSpec(
            num_scalar_prefetch=0,
            grid=(n_tiles,),
            in_specs=in_specs,
            out_specs=pl.BlockSpec((8, 128), lambda j: (0, 0)),
            scratch_shapes=[pltpu.VMEM((1, 1), jnp.float32)],
        ),
        compiler_params=compiler_params,
        cost_estimate=cost,
    )(*args)

    return partial_sum[0, 0] / jnp.float32(B * A)


def a2c_loss_ref(mean, std, actions, advantages):
    mean = mean.astype(jnp.float32)
    std = std.astype(jnp.float32)
    actions = actions.astype(jnp.float32)
    advantages = advantages.astype(jnp.float32)
    z = (actions - mean) / std
    logprob = -0.5 * z * z - jnp.log(std) - _HALF_LOG_2PI
    return jnp.mean((logprob + 1e-05) * advantages)


if __name__ == "__main__":
    def make_inputs(key, B, A, dtype=jnp.float32):
        k = jax.random.split(key, 4)
        mean = jax.random.normal(k[0], (B, A), dtype=jnp.float32)
        std = jax.nn.softplus(jax.random.normal(k[1], (B, A), dtype=jnp.float32)) + 0.1
        act = jax.random.normal(k[2], (B, A), dtype=jnp.float32)
        adv = jax.random.normal(k[3], (B, 1), dtype=jnp.float32)
        return tuple(x.astype(dtype) for x in (mean, std, act, adv))

    # 1) small, lane-packed, single tile (B*A = 256 -> 2 packed rows of 128 lanes)
    m, s, a, ad = make_inputs(jax.random.PRNGKey(0), 8, 32)
    loss = a2c_loss(m, s, a, ad)
    jax.block_until_ready(loss)
    ref = a2c_loss_ref(m, s, a, ad)
    assert jnp.allclose(loss, ref, atol=1e-5, rtol=1e-5), (loss, ref)

    # 2) lane-packed, multi-tile with remainder masking (250 packed rows, 64-row tiles)
    m2, s2, a2, ad2 = make_inputs(jax.random.PRNGKey(1), 1000, 32)
    loss2 = a2c_loss(m2, s2, a2, ad2, block_rows=64)
    jax.block_until_ready(loss2)
    ref2 = a2c_loss_ref(m2, s2, a2, ad2)
    assert jnp.allclose(loss2, ref2, atol=1e-4, rtol=1e-4), (loss2, ref2)

    # 3) bf16 inputs (recommended: halves HBM traffic); in-kernel math stays f32
    mb, sb, ab, adb = (x.astype(jnp.bfloat16) for x in (m2, s2, a2, ad2))
    loss3 = a2c_loss(mb, sb, ab, adb, block_rows=64)
    jax.block_until_ready(loss3)
    ref3 = a2c_loss_ref(mb, sb, ab, adb)
    assert jnp.allclose(loss3, ref3, atol=1e-4, rtol=1e-4), (loss3, ref3)

    # 4) non-lane-packable action dim -> row-wise fallback kernel (with masking)
    m4, s4, a4, ad4 = make_inputs(jax.random.PRNGKey(2), 100, 20)
    loss4 = a2c_loss(m4, s4, a4, ad4, block_rows=32)
    jax.block_until_ready(loss4)
    ref4 = a2c_loss_ref(m4, s4, a4, ad4)
    assert jnp.allclose(loss4, ref4, atol=1e-5, rtol=1e-5), (loss4, ref4)

    print("KERNEL_OK")
</pallas_src>

<mosaic_0001>
module attributes {stable_mosaic.version = 11 : i64} {
  func.func @_a2c_kernel_packed(%arg0: i32, %arg1: memref<2x128xf32, #tpu.memory_space<vmem>>, %arg2: memref<2x128xf32, #tpu.memory_space<vmem>>, %arg3: memref<2x128xf32, #tpu.memory_space<vmem>>, %arg4: memref<2x4xf32, #tpu.memory_space<vmem>>, %arg5: memref<8x128xf32, #tpu.memory_space<vmem>>, %arg6: memref<1x1xf32, #tpu.memory_space<vmem>>) attributes {dimension_semantics = [#tpu.dimension_semantics<arbitrary>], iteration_bounds = array<i64: 1>, scalar_prefetch = 0 : i64, scratch_operands = 1 : i64, tpu.core_type = #tpu.core_type<tc>, window_params = [{transform_indices = @transform_0, window_bounds = array<i64: 2, 128>}, {transform_indices = @transform_1, window_bounds = array<i64: 2, 128>}, {transform_indices = @transform_2, window_bounds = array<i64: 2, 128>}, {transform_indices = @transform_3, window_bounds = array<i64: 2, 4>}, {pipeline_mode = #tpu.pipeline_mode<synchronous>, transform_indices = @transform_4, window_bounds = array<i64: 8, 128>}]} {
    %c0_i32 = arith.constant 0 : i32
    %0 = arith.cmpi eq, %arg0, %c0_i32 : i32
    %1 = arith.extui %0 : i1 to i32
    %c0_i32_0 = arith.constant 0 : i32
    %2 = arith.cmpi ne, %1, %c0_i32_0 : i32
    scf.if %2 {
      %cst_25 = arith.constant 0.000000e+00 : f32
      %61 = vector.broadcast %cst_25 : f32 to vector<1x1xf32>
      %c0_26 = arith.constant 0 : index
      %c0_27 = arith.constant 0 : index
      %62 = vector.load %arg6[%c0_26, %c0_27] : memref<1x1xf32, #tpu.memory_space<vmem>>, vector<1x1xf32>
      tpu.vector_store %arg6[%c0_26, %c0_27], %61 {strides = array<i32>} : memref<1x1xf32, #tpu.memory_space<vmem>>, vector<1x1xf32>,
    } else {
    }
    %c0 = arith.constant 0 : index
    %c0_1 = arith.constant 0 : index
    %3 = vector.load %arg1[%c0, %c0_1] : memref<2x128xf32, #tpu.memory_space<vmem>>, vector<2x128xf32>
    %c0_2 = arith.constant 0 : index
    %c0_3 = arith.constant 0 : index
    %4 = vector.load %arg2[%c0_2, %c0_3] : memref<2x128xf32, #tpu.memory_space<vmem>>, vector<2x128xf32>
    %c0_4 = arith.constant 0 : index
    %c0_5 = arith.constant 0 : index
    %5 = vector.load %arg3[%c0_4, %c0_5] : memref<2x128xf32, #tpu.memory_space<vmem>>, vector<2x128xf32>
    %6 = tpu.reciprocal %4 : vector<2x128xf32> -> vector<2x128xf32>
    %7 = arith.subf %5, %3 : vector<2x128xf32>
    %8 = arith.mulf %7, %6 : vector<2x128xf32>
    %9 = arith.mulf %8, %8 : vector<2x128xf32>
    %cst = arith.constant -5.000000e-01 : f32
    %10 = vector.broadcast %cst : f32 to vector<2x128xf32>
    %11 = arith.mulf %10, %9 : vector<2x128xf32>
    %12 = math.log %4 : vector<2x128xf32>
    %13 = arith.subf %11, %12 : vector<2x128xf32>
    %cst_6 = arith.constant 0.918938517 : f32
    %14 = vector.broadcast %cst_6 : f32 to vector<2x128xf32>
    %15 = arith.subf %13, %14 : vector<2x128xf32>
    %c0_7 = arith.constant 0 : index
    %c0_8 = arith.constant 0 : index
    %16 = vector.load %arg4[%c0_7, %c0_8] : memref<2x4xf32, #tpu.memory_space<vmem>>, vector<2x4xf32>
    %cst_9 = arith.constant 0.000000e+00 : f32
    %17 = vector.broadcast %cst_9 : f32 to vector<2x1xf32>
    %18 = vector.extract_strided_slice %15 {offsets = [0, 0], sizes = [2, 32], strides = [1, 1]} : vector<2x128xf32> to vector<2x32xf32>
    %cst_10 = arith.constant dense<0.000000e+00> : vector<2xf32>
    %19 = vector.multi_reduction <add>, %18, %cst_10 [1] : vector<2x32xf32> to vector<2xf32>
    %20 = vector.shape_cast %19 : vector<2xf32> to vector<2x1xf32>
    %cst_11 = arith.constant 3.200000e-04 : f32
    %21 = vector.broadcast %cst_11 : f32 to vector<2x1xf32>
    %22 = arith.addf %20, %21 : vector<2x1xf32>
    %23 = vector.extract_strided_slice %16 {offsets = [0, 0], sizes = [2, 1], strides = [1, 1]} : vector<2x4xf32> to vector<2x1xf32>
    %24 = arith.mulf %22, %23 : vector<2x1xf32>
    %25 = arith.addf %17, %24 : vector<2x1xf32>
    %26 = vector.extract_strided_slice %15 {offsets = [0, 32], sizes = [2, 32], strides = [1, 1]} : vector<2x128xf32> to vector<2x32xf32>
    %cst_12 = arith.constant dense<0.000000e+00> : vector<2xf32>
    %27 = vector.multi_reduction <add>, %26, %cst_12 [1] : vector<2x32xf32> to vector<2xf32>
    %28 = vector.shape_cast %27 : vector<2xf32> to vector<2x1xf32>
    %cst_13 = arith.constant 3.200000e-04 : f32
    %29 = vector.broadcast %cst_13 : f32 to vector<2x1xf32>
    %30 = arith.addf %28, %29 : vector<2x1xf32>
    %31 = vector.extract_strided_slice %16 {offsets = [0, 1], sizes = [2, 1], strides = [1, 1]} : vector<2x4xf32> to vector<2x1xf32>
    %32 = arith.mulf %30, %31 : vector<2x1xf32>
    %33 = arith.addf %25, %32 : vector<2x1xf32>
    %34 = vector.extract_strided_slice %15 {offsets = [0, 64], sizes = [2, 32], strides = [1, 1]} : vector<2x128xf32> to vector<2x32xf32>
    %cst_14 = arith.constant dense<0.000000e+00> : vector<2xf32>
    %35 = vector.multi_reduction <add>, %34, %cst_14 [1] : vector<2x32xf32> to vector<2xf32>
    %36 = vector.shape_cast %35 : vector<2xf32> to vector<2x1xf32>
    %cst_15 = arith.constant 3.200000e-04 : f32
    %37 = vector.broadcast %cst_15 : f32 to vector<2x1xf32>
    %38 = arith.addf %36, %37 : vector<2x1xf32>
    %39 = vector.extract_strided_slice %16 {offsets = [0, 2], sizes = [2, 1], strides = [1, 1]} : vector<2x4xf32> to vector<2x1xf32>
    %40 = arith.mulf %38, %39 : vector<2x1xf32>
    %41 = arith.addf %33, %40 : vector<2x1xf32>
    %42 = vector.extract_strided_slice %15 {offsets = [0, 96], sizes = [2, 32], strides = [1, 1]} : vector<2x128xf32> to vector<2x32xf32>
    %cst_16 = arith.constant dense<0.000000e+00> : vector<2xf32>
    %43 = vector.multi_reduction <add>, %42, %cst_16 [1] : vector<2x32xf32> to vector<2xf32>
    %44 = vector.shape_cast %43 : vector<2xf32> to vector<2x1xf32>
    %cst_17 = arith.constant 3.200000e-04 : f32
    %45 = vector.broadcast %cst_17 : f32 to vector<2x1xf32>
    %46 = arith.addf %44, %45 : vector<2x1xf32>
    %47 = vector.extract_strided_slice %16 {offsets = [0, 3], sizes = [2, 1], strides = [1, 1]} : vector<2x4xf32> to vector<2x1xf32>
    %48 = arith.mulf %46, %47 : vector<2x1xf32>
    %49 = arith.addf %41, %48 : vector<2x1xf32>
    %c0_18 = arith.constant 0 : index
    %c0_19 = arith.constant 0 : index
    %50 = vector.load %arg6[%c0_18, %c0_19] : memref<1x1xf32, #tpu.memory_space<vmem>>, vector<1x1xf32>
    %51 = vector.shape_cast %49 : vector<2x1xf32> to vector<1x2x1xf32>
    %cst_20 = arith.constant dense<0.000000e+00> : vector<1xf32>
    %52 = vector.multi_reduction <add>, %51, %cst_20 [1, 2] : vector<1x2x1xf32> to vector<1xf32>
    %53 = vector.shape_cast %52 : vector<1xf32> to vector<1x1x1xf32>
    %54 = vector.extract %53[0, 0, 0] : f32 from vector<1x1x1xf32>
    %55 = vector.broadcast %54 : f32 to vector<1x1xf32>
    %56 = arith.addf %50, %55 : vector<1x1xf32>
    %c0_21 = arith.constant 0 : index
    %c0_22 = arith.constant 0 : index
    %57 = vector.load %arg6[%c0_21, %c0_22] : memref<1x1xf32, #tpu.memory_space<vmem>>, vector<1x1xf32>
    tpu.vector_store %arg6[%c0_21, %c0_22], %56 {strides = array<i32>} : memref<1x1xf32, #tpu.memory_space<vmem>>, vector<1x1xf32>,
    %c0_i32_23 = arith.constant 0 : i32
    %58 = arith.cmpi eq, %arg0, %c0_i32_23 : i32
    %59 = arith.extui %58 : i1 to i32
    %c0_i32_24 = arith.constant 0 : i32
    %60 = arith.cmpi ne, %59, %c0_i32_24 : i32
    scf.if %60 {
      %c0_25 = arith.constant 0 : index
      %c0_26 = arith.constant 0 : index
      %61 = vector.load %arg6[%c0_25, %c0_26] : memref<1x1xf32, #tpu.memory_space<vmem>>, vector<1x1xf32>
      %62 = vector.shape_cast %61 : vector<1x1xf32> to vector<1x1xf32>
      %63 = vector.broadcast %62 : vector<1x1xf32> to vector<8x128xf32>
      %c0_27 = arith.constant 0 : index
      %c0_28 = arith.constant 0 : index
      %64 = vector.load %arg5[%c0_27, %c0_28] : memref<8x128xf32, #tpu.memory_space<vmem>>, vector<8x128xf32>
      tpu.vector_store %arg5[%c0_27, %c0_28], %63 {strides = array<i32>} : memref<8x128xf32, #tpu.memory_space<vmem>>, vector<8x128xf32>,
    } else {
    }
    return
  }
  func.func @transform_0(%arg0: i32) -> (i32, i32) {
    %c0_i32 = arith.constant 0 : i32
    %c0_i32_0 = arith.constant 0 : i32
    return %arg0, %c0_i32 : i32, i32
  }
  func.func @transform_1(%arg0: i32) -> (i32, i32) {
    %c0_i32 = arith.constant 0 : i32
    %c0_i32_0 = arith.constant 0 : i32
    return %arg0, %c0_i32 : i32, i32
  }
  func.func @transform_2(%arg0: i32) -> (i32, i32) {
    %c0_i32 = arith.constant 0 : i32
    %c0_i32_0 = arith.constant 0 : i32
    return %arg0, %c0_i32 : i32, i32
  }
  func.func @transform_3(%arg0: i32) -> (i32, i32) {
    %c0_i32 = arith.constant 0 : i32
    %c0_i32_0 = arith.constant 0 : i32
    return %arg0, %c0_i32 : i32, i32
  }
  func.func @transform_4(%arg0: i32) -> (i32, i32) {
    %c0_i32 = arith.constant 0 : i32
    %c0_i32_0 = arith.constant 0 : i32
    %c0_i32_1 = arith.constant 0 : i32
    return %c0_i32, %c0_i32_0 : i32, i32
  }
}

</mosaic_0001>

<bundles_post_ra>
// kernel: tpu_custom_call.1
= control target key start
LH: loop header
LB: loop body
LE: loop exit
PB: predicated region body
PF: predicated region fallthrough
CT: control target
= control target key end

     0   :  { %9 = vsyncpa [#allocation4], 0  ;;  %s279_s0 = inlined_call_operand.hbm [shape: f32[2,128], index: 0, kind: input, shape index: {}]   ;;  %s280_s1 = inlined_call_operand.vmem [shape: f32[2,128], index: 1, kind: input, shape index: {}]   ;;  %s281_s2 = inlined_call_operand.vmem [shape: f32[2,128], index: 2, kind: input, shape index: {}]   ;;  %s282_s3 = inlined_call_operand.vmem [shape: f32[2,4], index: 3, kind: input, shape index: {}]   ;;  %s283_s4 = inlined_call_operand.hbm [shape: f32[8,128], index: 4, kind: output, shape index: {}]  }
   0x1   :  { %10 = vsyncpa [#allocation5], 0  ;;  %s209_s15 = smov [#allocation3]   ;;  %s161_s19 = scalar_lea.hbm %s279_s0, 32 }
   0x2   :  { %s17_s16 = sshll.u32 %s209_s15, 4  ;;  %p162_p0 = scmp.ne.s32.totalorder %s279_s0, %s161_s19  ;;  %s18_s16 = int_to_ptr.vmem [resolvable:$true] %s17_s16 }
   0x3   :  { %p165_p1 = scmp.lt.u32.totalorder %s161_s19, %s279_s0 }
   0x5   :  { %p167_p2 = pnand %p165_p1, %p162_p0 }
   0x7   :  { %170 = shalt.err (!%p167_p2)
}
   0x8   :  { %s171_s24 = scalar_lea.vmem %s18_s16, 32  ;;  %p176_p4 = scmp.lt.s32.totalorder %s18_s16, %s18_s16 }
   0x9   :  { %p172_p3 = scmp.ne.s32.totalorder %s18_s16, %s171_s24  ;;  %p177_p5 = scmp.lt.s32.totalorder %s171_s24, %s171_s24 }
   0xb   :  { %p178_p6 = por %p177_p5, %p176_p4 }
   0xd   :  { %p179_p7 = pnand %p178_p6, %p172_p3 }
   0xf   :  { %182 = shalt.err (!%p179_p7)
}
  0x10   :  { %20 = dma.hbm_to_vmem [thread:$0]  %s279_s0, 32, %s18_s16, [#allocation4]  }
  0x11   :  { %205 = dma.done.wait [#allocation4], 32  }
  0x12   :  { %206 = vsyncadd [#allocation4], 4294967264  ;;  %v37_v0 = vld [vmem:[%s280_s1] sm:$0x3]  ;;  %s210_s0 = smov 96   ;;  %s211_s5 = smov 32  }
  0x13   :  { %157 = vrcp.f32 %v37_v0  ;;  %v36_v1 = vld [vmem:[#allocation3] sm:$0x3]  ;;  %s212_s1 = smov 64   ;;  %vm49_vm0 = vcmask 254976   ;;  %s213_s7 = smov 127   ;;  %vm97_vm1 = vcmask 1024  }
  0x14   :  { %159 = vlog2.f32 %v37_v0  ;;  %v38_v2 = vld [vmem:[%s281_s2] sm:$0x3]  ;;  %s214_s8 = smov 126   ;;  %s215_s9 = smov 125   ;;  %vm34_vm2 = vcmask 0   ;;  %v216_v39 = vmov 0.0  }
  0x15   :  { %v40_v3 = vsub.f32 %v38_v2, %v36_v1  ;;  %v48_v19 = vld [vmem:[%s282_s3] sm:$0x3]  ;;  %35 = vst.msk [vmem:[#allocation2] sm:$0x1] %vm34_vm2, %v216_v39  ;;  %v217_v40 = vmov 0   ;;  %s218_s10 = smov [#allocation6]  }
  0x16   :  { %155 = vset.pattern.permute.xlu1 %v217_v40  ;;  %156 = vset.pattern.permute.xlu0 %v217_v40  ;;  %s132_s11 = sshll.u32 %s218_s10, 4  ;;  %s133_s11 = int_to_ptr.vmem [resolvable:$true] %s132_s11 }
  0x17   :  { %s183_s12 = scalar_lea.vmem %s133_s11, 128  ;;  %p188_p9 = scmp.lt.s32.totalorder %s133_s11, %s133_s11 }
  0x18   :  { %p184_p8 = scmp.ne.s32.totalorder %s133_s11, %s183_s12  ;;  %p189_p10 = scmp.lt.s32.totalorder %s183_s12, %s183_s12 }
  0x1a   :  { %p190_p11 = por %p189_p10, %p188_p9 }
  0x1c   :  { %v96_v48 = vld [vmem:[#allocation2] sm:$0x1]  ;;  %p191_p12 = pnand %p190_p11, %p184_p8 }
  0x1d   :  { %v158_v4 = vpop.eup %157 }
  0x1e   :  { %v160_v5 = vpop.eup %159  ;;  %v41_v6 = vmul.f32 %v158_v4, %v40_v3 }
  0x1f   :  { %v45_v8 = vmul.f32 0.6931472, %v160_v5 }
  0x20   :  { %v42_v7 = vmul.f32 %v41_v6, %v41_v6 }
  0x22   :  { %v43_v9 = vmul.f32 -0.5, %v42_v7 }
  0x24   :  { %v46_v10 = vsub.f32 %v43_v9, %v45_v8 }
  0x26   :  { %v141_v11 = vadd.f32 -0.9189385, %v46_v10 }
  0x28   :  { %57 = vrot.lane.b32.xlu0 %v141_v11, %s210_s0  ;;  %83 = vrot.lane.b32.xlu1 %v141_v11, %s211_s5  ;;  %v50_v14 = vsel %vm49_vm0, %v141_v11, 0.0 }
  0x2c   :  { %70 = vrot.lane.b32.xlu0 %v141_v11, %s212_s1 }
  0x9a   :  { %v58_v12 = vpop.permute.xlu0 %57  ;;  %v84_v16 = vpop.permute.xlu1 %83 }
  0x9b   :  { %v60_v13 = vsel %vm49_vm0, %v58_v12, 0.0  ;;  %v86_v18 = vsel %vm49_vm0, %v84_v16, 0.0 }
  0x9c   :  { %61 = vadd.xlane.f32.xlu1 %v60_v13 }
  0x9e   :  { %v71_v15 = vpop.permute.xlu0 %70 }
  0x9f   :  { %v73_v17 = vsel %vm49_vm0, %v71_v15, 0.0 }
  0xa0   :  { %74 = vadd.xlane.f32.xlu0 %v73_v17  ;;  %51 = vadd.xlane.f32.xlu1 %v50_v14 }
  0xa4   :  { %87 = vadd.xlane.f32.xlu0 %v86_v18 }
 0x129   :  { %v62_v20 = vpop.xlane.xlu1 %61 }
 0x12a   :  { %v63_v21 = vadd.f32 0.00032, %v62_v20 }
 0x12c   :  { %v64_v22 = vmul.f32 %v63_v21, %v48_v19 }
 0x12d   :  { %v75_v23 = vpop.xlane.xlu0 %74  ;;  %v52_v29 = vpop.xlane.xlu1 %51 }
 0x12e   :  { %v76_v24 = vadd.f32 0.00032, %v75_v23  ;;  %66 = vrot.lane.b32.xlu0 %v64_v22, %s213_s7  ;;  %v53_v30 = vadd.f32 0.00032, %v52_v29 }
 0x130   :  { %v77_v25 = vmul.f32 %v76_v24, %v48_v19  ;;  %v54_v31 = vmul.f32 %v53_v30, %v48_v19 }
 0x131   :  { %v88_v26 = vpop.xlane.xlu0 %87 }
 0x132   :  { %v89_v27 = vadd.f32 0.00032, %v88_v26  ;;  %79 = vrot.lane.b32.xlu1 %v77_v25, %s214_s8 }
 0x134   :  { %v90_v28 = vmul.f32 %v89_v27, %v48_v19 }
 0x136   :  { %92 = vrot.lane.b32.xlu1 %v90_v28, %s215_s9 }
 0x1a0   :  { %v67_v32 = vpop.permute.xlu0 %66 }
 0x1a1   :  { %v69_v34 = vadd.f32 %v67_v32, %v54_v31 }
 0x1a4   :  { %v80_v33 = vpop.permute.xlu1 %79 }
 0x1a5   :  { %v82_v35 = vadd.f32 %v80_v33, %v69_v34 }
 0x1a8   :  { %v93_v36 = vpop.permute.xlu1 %92 }
 0x1a9   :  { %v95_v37 = vadd.f32 %v93_v36, %v82_v35 }
 0x1ab   :  { %v98_v38 = vsel %vm97_vm1, %v95_v37, 0.0 }
 0x1ac   :  { %99 = vadd.xlane.f32.xlu0 %v98_v38 }
 0x239   :  { %v100_v41 = vpop.xlane.xlu0 %99 }
 0x23a   :  { %v101_v42 = vrot.slane %v100_v41, 4 }
 0x23c   :  { %v102_v43 = vadd.f32 %v101_v42, %v100_v41 }
 0x23e   :  { %v103_v44 = vrot.slane %v102_v43, 2 }
 0x240   :  { %v104_v45 = vadd.f32 %v103_v44, %v102_v43 }
 0x242   :  { %v105_v46 = vrot.slane %v104_v45, 1 }
 0x244   :  { %v106_v47 = vadd.f32 %v105_v46, %v104_v45 }
 0x246   :  { %143 = vpush %v106_v47 }
 0x277   :  { %s144_s3 = spop %143 }
 0x278   :  { %v108_v49 = vstv %s144_s3 }
 0x279   :  { %v109_v50 = vadd.f32 %v108_v49, %v96_v48 }
 0x27b   :  { %111 = vst.msk [vmem:[#allocation2] sm:$0x1] %vm34_vm2, %v109_v50 }
 0x282   :  { %v142_v51 = vld [vmem:[#allocation2] ss:$0 sm:$0xff] }
 0x283   :  { %122 = vperm.xlu1 %155, %v142_v51  }
 0x302   :  { %v123_v52 = vpop.permute.xlu1 %122 }
 0x303   :  { %125 = vst [vmem:[#allocation6] sm:$0xff] %v123_v52 }
 0x304   :  { %194 = shalt.err (!%p191_p12)
}
 0x305   :  { %s195_s15 = scalar_lea.hbm %s283_s4, 128 }
 0x306   :  { %p196_p13 = scmp.ne.s32.totalorder %s283_s4, %s195_s15  ;;  %p199_p0 = scmp.lt.u32.totalorder %s195_s15, %s283_s4 }
 0x308   :  { %p201_p1 = pnand %p199_p0, %p196_p13 }
 0x30a   :  { %204 = shalt.err (!%p201_p1)
}
 0x30b   :  { %135 = dma.vmem_to_hbm [thread:$0]  %s133_s11, 128, %s283_s4, [#allocation5]  }
 0x30c   :  { %207 = dma.done.wait [#allocation5], 128  }
 0x30d   :  { %208 = vsyncadd [#allocation5], 4294967168 }
 0x30e   :  { %139 = vsyncpa [#allocation4], 1 }
 0x30f   :  { %140 = vsyncpa [#allocation5], 1 }

</bundles_post_ra>
